<compile_context>
chip_gen: v5e
topology: v5e:2x2
jax: 0.10.0
libtpu: 0.0.40
codegen_flags: <defaults>
</compile_context>

<pallas_src>
import numpy as np

import jax
import jax.numpy as jnp
from jax.experimental import pallas as pl
from jax.experimental.pallas import tpu as pltpu


NUM_CLASSES = 3           # small synthetic class count
HIDDEN = 32               # stem conv output channels
KSIZE = 3                 # stem conv kernel size
OUT_CH = 5 + NUM_CLASSES  # box(4) + obj(1) + cls(NUM_CLASSES)


def _detector_kernel(x_ref, w1_ref, b1_ref, w2_ref, b2_ref, mask_ref, o_ref):
    """Single invocation over the whole (tiny) batch; everything is in VMEM.

    x_ref   : [B*H, K_PAD]       dh-stacked padded image rows, zero-padded K, bf16
    w1_ref  : [K_PAD, W*HID]     3x3 stem conv folded to stacked block-Toeplitz, bf16
    b1_ref  : [1, W*HID]         stem bias tiled over W, f32
    w2_ref  : [W*HID, W*OUT_CH]  1x1 head conv folded to block-diagonal, bf16
    b2_ref  : [1, W*OUT_CH]      head bias tiled over W, f32
    mask_ref: [1, W*OUT_CH]      1 where sigmoid applies (obj/cls), 0 (box), bf16
    o_ref   : [B*H, W*OUT_CH]    raw detections, lane-dense, bf16
    """
    # 3x3 stem conv: one fused MXU matmul (K ~= 256), f32 accumulation,
    # bias folded onto the matmul result (no separate zeros-init pass).
    h = jnp.dot(x_ref[...], w1_ref[...],
                preferred_element_type=jnp.float32) + b1_ref[...]
    h = h * jax.nn.sigmoid(h)                       # SiLU in f32 (v5e-friendly)

    # 1x1 head conv as a block-diagonal matmul so the result is already packed
    # [B*H, W*OUT_CH]  ->  128-lane-dense stores, no masked vst.
    y = jnp.dot(h.astype(w2_ref.dtype), w2_ref[...],
                preferred_element_type=jnp.float32) + b2_ref[...]

    # YOLOX-style decode: sigmoid on obj/cls channels, raw box regression.
    # The channel selector is a precomputed bf16 {0,1} constant (no iota/mod).
    y = jnp.where(mask_ref[...] != 0, jax.nn.sigmoid(y), y)

    o_ref[...] = y.astype(o_ref.dtype)


@jax.jit
def detector_forward(batch_nchw, folded_params):
    """Equivalent of Detector.forward(batch): cast to half, run the model."""
    w1_big, b1_big, w2_big, b2_big, prob_mask = folded_params

    # `.half()` cast (bf16 on TPU, see TODO above).
    x = batch_nchw.astype(jnp.bfloat16)
    B, C, H, W = x.shape
    KW = (W + 2) * C              # flattened (padded width, channel) axis
    K_PAD = w1_big.shape[0]       # KSIZE*KW rounded up to a multiple of 128
    NO = w2_big.shape[1]          # packed output axis (128 for W=16, OUT_CH=8)

    # Cheap layout glue (tiny at 16x16): NCHW -> NHWC, same-pad, flatten,
    # stack the three dh-shifted row views along K, zero-pad K, stack batch
    # along M so a single [B*H, K_PAD] matmul covers the whole batch.
    x_nhwc = jnp.transpose(x, (0, 2, 3, 1))
    xp = jnp.pad(x_nhwc, ((0, 0), (1, 1), (1, 1), (0, 0)))
    x3 = xp.reshape(B, H + 2, KW)
    xs = jnp.concatenate([x3[:, dh:dh + H, :] for dh in range(KSIZE)], axis=-1)
    xs = jnp.pad(xs, ((0, 0), (0, 0), (0, K_PAD - KSIZE * KW)))
    xs = xs.reshape(B * H, K_PAD)

    vmem = pltpu.MemorySpace.VMEM
    out = pl.pallas_call(
        _detector_kernel,
        out_shape=jax.ShapeDtypeStruct((B * H, NO), jnp.bfloat16),
        # No grid: one invocation, every operand fully resident in VMEM
        # (< 0.5 MB total), no per-step pipeline overhead, no double-buffering.
        in_specs=[pl.BlockSpec(memory_space=vmem)] * 6,
        out_specs=pl.BlockSpec(memory_space=vmem),
    )(xs, w1_big, b1_big, w2_big, b2_big, prob_mask)

    # YOLOX-style flattened predictions: [B, num_anchors(=H*W), 5+num_classes]
    return out.reshape(B, H * W, OUT_CH)


def make_params(in_channels):
    """Deterministic synthetic stem+head weights (stand-in for the checkpoint)."""
    key = jax.random.PRNGKey(0)
    k1, k2, k3, k4 = jax.random.split(key, 4)
    C = in_channels
    w1 = jax.random.normal(k1, (KSIZE, KSIZE, C, HIDDEN), jnp.float32) * 0.1
    b1 = jax.random.normal(k2, (HIDDEN,), jnp.float32) * 0.01
    w2 = jax.random.normal(k3, (HIDDEN, OUT_CH), jnp.float32) * 0.1
    b2 = jax.random.normal(k4, (OUT_CH,), jnp.float32) * 0.01
    # Round conv weights to bf16 once so the folded kernel weights and the
    # plain-JAX reference use bit-identical values.
    w1 = np.asarray(w1.astype(jnp.bfloat16).astype(jnp.float32))
    w2 = np.asarray(w2.astype(jnp.bfloat16).astype(jnp.float32))
    return w1, np.asarray(b1), w2, np.asarray(b2)


def fold_params(w1, b1, w2, b2, width):
    """Fold the 3x3 stem + 1x1 head into the kernel's matrix form (host-side).

    w1_stack[dh*KW + s*C + c, j*HID + o] = w1[dh, s - j, c, o]  for 0 <= s-j <= 2
    (stacked banded block-Toeplitz: folds the dh/dw/channel reduction and the
    width axis into one K-axis, then zero-pads K up to a multiple of 128),
    w2_big = blockdiag_W(w2) so the head output comes out packed [*, W*OUT_CH].
    Done once on the host -- this is the stand-in for checkpoint loading.
    """
    C = w1.shape[2]
    W = width
    kw = (W + 2) * C
    k_pad = ((KSIZE * kw + 127) // 128) * 128         # 216 -> 256 at W=16,C=4
    w1_big = np.zeros((KSIZE, kw, W * HIDDEN), np.float32)
    for dh in range(KSIZE):
        for dw in range(KSIZE):
            shift = np.eye(W + 2, W, k=-dw, dtype=np.float32)  # [s,j]=1 iff s=j+dw
            w1_big[dh] += np.kron(shift, w1[dh, dw])
    w1_stack = np.zeros((k_pad, W * HIDDEN), np.float32)
    w1_stack[:KSIZE * kw] = w1_big.reshape(KSIZE * kw, W * HIDDEN)
    w2_big = np.kron(np.eye(W, dtype=np.float32), w2)          # [W*HID, W*OUT_CH]
    b1_big = np.tile(b1, W)[None, :].astype(np.float32)
    b2_big = np.tile(b2, W)[None, :].astype(np.float32)
    prob_mask = np.tile((np.arange(OUT_CH) >= 4).astype(np.float32), W)[None, :]
    return (jnp.asarray(w1_stack, jnp.bfloat16),
            jnp.asarray(b1_big, jnp.float32),
            jnp.asarray(w2_big, jnp.bfloat16),
            jnp.asarray(b2_big, jnp.float32),
            jnp.asarray(prob_mask, jnp.bfloat16))


def reference_forward(batch_nchw, w1, b1, w2, b2):
    """Plain-JAX reference (explicit im2col) mirroring the kernel's dtype flow."""
    x = batch_nchw.astype(jnp.bfloat16)
    B, C, H, W = x.shape
    xn = jnp.transpose(x, (0, 2, 3, 1))
    xp = jnp.pad(xn, ((0, 0), (1, 1), (1, 1), (0, 0)))
    cols = []
    for dh in range(KSIZE):
        for dw in range(KSIZE):
            cols.append(xp[:, dh:dh + H, dw:dw + W, :])
    patches = jnp.concatenate(cols, axis=-1).reshape(B * H * W, KSIZE * KSIZE * C)
    w1_mat = jnp.asarray(w1.reshape(KSIZE * KSIZE * C, HIDDEN), jnp.bfloat16)
    w2_mat = jnp.asarray(w2, jnp.bfloat16)
    h = jnp.dot(patches, w1_mat, preferred_element_type=jnp.float32) + jnp.asarray(b1)
    h = h * jax.nn.sigmoid(h)
    y = jnp.dot(h.astype(jnp.bfloat16), w2_mat,
                preferred_element_type=jnp.float32) + jnp.asarray(b2)
    y = jnp.where(jnp.arange(OUT_CH) >= 4, jax.nn.sigmoid(y), y)
    return y.reshape(B, H * W, OUT_CH).astype(jnp.bfloat16)


if __name__ == "__main__":
    B, C, H, W = 2, 4, 16, 16
    key = jax.random.PRNGKey(0)
    batch = jax.random.normal(key, (B, C, H, W), jnp.float32)  # NCHW, like torch

    w1, b1, w2, b2 = make_params(C)
    folded = fold_params(w1, b1, w2, b2, W)

    out = detector_forward(batch, folded)
    out = jax.block_until_ready(out)

    assert out.shape == (B, H * W, OUT_CH)
    assert out.dtype == jnp.bfloat16

    # Correctness check against the plain-JAX reference (same bf16/f32 flow).
    ref = reference_forward(batch, w1, b1, w2, b2)
    np.testing.assert_allclose(np.asarray(out.astype(jnp.float32)),
                               np.asarray(ref.astype(jnp.float32)),
                               rtol=5e-2, atol=5e-2)
    print("KERNEL_OK")
</pallas_src>

<mosaic_0001>
module attributes {stable_mosaic.version = 11 : i64} {
  func.func @_detector_kernel(%arg0: memref<32x256xbf16, #tpu.memory_space<vmem>>, %arg1: memref<256x512xbf16, #tpu.memory_space<vmem>>, %arg2: memref<1x512xf32, #tpu.memory_space<vmem>>, %arg3: memref<512x128xbf16, #tpu.memory_space<vmem>>, %arg4: memref<1x128xf32, #tpu.memory_space<vmem>>, %arg5: memref<1x128xbf16, #tpu.memory_space<vmem>>, %arg6: memref<32x128xbf16, #tpu.memory_space<vmem>>) attributes {dimension_semantics = [], scalar_prefetch = 0 : i64, scratch_operands = 0 : i64, tpu.core_type = #tpu.core_type<tc>} {
    %c0 = arith.constant 0 : index
    %c0_0 = arith.constant 0 : index
    %0 = vector.load %arg0[%c0, %c0_0] : memref<32x256xbf16, #tpu.memory_space<vmem>>, vector<32x256xbf16>
    %c0_1 = arith.constant 0 : index
    %c0_2 = arith.constant 0 : index
    %1 = vector.load %arg1[%c0_1, %c0_2] : memref<256x512xbf16, #tpu.memory_space<vmem>>, vector<256x512xbf16>
    %cst = arith.constant dense<0.000000e+00> : vector<32x512xf32>
    %2 = tpu.matmul %0, %1, %cst {dimension_numbers = #tpu.dot_dimension_numbers<[1], [0], [0], [1], [0, 0, 1, 1], [], []>} : vector<32x256xbf16>, vector<256x512xbf16>, vector<32x512xf32> -> vector<32x512xf32>
    %c0_3 = arith.constant 0 : index
    %c0_4 = arith.constant 0 : index
    %3 = vector.load %arg2[%c0_3, %c0_4] : memref<1x512xf32, #tpu.memory_space<vmem>>, vector<1x512xf32>
    %4 = vector.broadcast %3 : vector<1x512xf32> to vector<32x512xf32>
    %5 = arith.addf %2, %4 : vector<32x512xf32>
    %6 = arith.negf %5 : vector<32x512xf32>
    %7 = math.exp %6 : vector<32x512xf32>
    %cst_5 = arith.constant 1.000000e+00 : f32
    %8 = vector.broadcast %cst_5 : f32 to vector<32x512xf32>
    %9 = arith.addf %8, %7 : vector<32x512xf32>
    %10 = arith.divf %8, %9 : vector<32x512xf32>
    %11 = arith.mulf %5, %10 : vector<32x512xf32>
    %12 = arith.truncf %11 : vector<32x512xf32> to vector<32x512xbf16>
    %c0_6 = arith.constant 0 : index
    %c0_7 = arith.constant 0 : index
    %13 = vector.load %arg3[%c0_6, %c0_7] : memref<512x128xbf16, #tpu.memory_space<vmem>>, vector<512x128xbf16>
    %cst_8 = arith.constant dense<0.000000e+00> : vector<32x128xf32>
    %14 = tpu.matmul %12, %13, %cst_8 {dimension_numbers = #tpu.dot_dimension_numbers<[1], [0], [0], [1], [0, 0, 1, 1], [], []>} : vector<32x512xbf16>, vector<512x128xbf16>, vector<32x128xf32> -> vector<32x128xf32>
    %c0_9 = arith.constant 0 : index
    %c0_10 = arith.constant 0 : index
    %15 = vector.load %arg4[%c0_9, %c0_10] : memref<1x128xf32, #tpu.memory_space<vmem>>, vector<1x128xf32>
    %16 = vector.broadcast %15 : vector<1x128xf32> to vector<32x128xf32>
    %17 = arith.addf %14, %16 : vector<32x128xf32>
    %c0_11 = arith.constant 0 : index
    %c0_12 = arith.constant 0 : index
    %18 = vector.load %arg5[%c0_11, %c0_12] : memref<1x128xbf16, #tpu.memory_space<vmem>>, vector<1x128xbf16>
    %cst_13 = arith.constant 0.000000e+00 : bf16
    %19 = vector.broadcast %cst_13 : bf16 to vector<1x128xbf16>
    %20 = arith.cmpf one, %18, %19 : vector<1x128xbf16>
    %21 = arith.negf %17 : vector<32x128xf32>
    %22 = math.exp %21 : vector<32x128xf32>
    %cst_14 = arith.constant 1.000000e+00 : f32
    %23 = vector.broadcast %cst_14 : f32 to vector<32x128xf32>
    %24 = arith.addf %23, %22 : vector<32x128xf32>
    %25 = arith.divf %23, %24 : vector<32x128xf32>
    %26 = vector.shape_cast %20 : vector<1x128xi1> to vector<1x128xi1>
    %27 = vector.broadcast %26 : vector<1x128xi1> to vector<32x128xi1>
    %28 = arith.select %27, %25, %17 : vector<32x128xi1>, vector<32x128xf32>
    %29 = arith.truncf %28 : vector<32x128xf32> to vector<32x128xbf16>
    %c0_15 = arith.constant 0 : index
    %c0_16 = arith.constant 0 : index
    %30 = vector.load %arg6[%c0_15, %c0_16] : memref<32x128xbf16, #tpu.memory_space<vmem>>, vector<32x128xbf16>
    tpu.vector_store %arg6[%c0_15, %c0_16], %29 {strides = array<i32>} : memref<32x128xbf16, #tpu.memory_space<vmem>>, vector<32x128xbf16>,
    return
  }
}

</mosaic_0001>

<bundles_post_ra>
// kernel: detector_forward.1
= control target key start
LH: loop header
LB: loop body
LE: loop exit
PB: predicated region body
PF: predicated region fallthrough
CT: control target
= control target key end

     0   :  { %s2942_s1 = inlined_call_operand.vmem [shape: bf16[256,512], index: 1, kind: input, shape index: {}]   ;;  %s2943_s0 = inlined_call_operand.vmem [shape: bf16[32,256], index: 0, kind: input, shape index: {}]   ;;  %s2944_s3 = inlined_call_operand.vmem [shape: bf16[512,128], index: 3, kind: input, shape index: {}]   ;;  %s2945_s4 = inlined_call_operand.vmem [shape: f32[1,128], index: 4, kind: input, shape index: {}]   ;;  %s2946_s2 = inlined_call_operand.vmem [shape: f32[1,512], index: 2, kind: input, shape index: {}]   ;;  %s2947_s5 = inlined_call_operand.vmem [shape: bf16[1,128], index: 5, kind: input, shape index: {}]   ;;  %s2948_s6 = inlined_call_operand.vmem [shape: bf16[32,128], index: 6, kind: output, shape index: {}]  }
   0x1   :  { %v1485_v0 = vld [vmem:[%s2942_s1 + $0xe0] sm:$0xf]  ;;  %v1809_v1 = vld [vmem:[%s2942_s1 + $0xec] sm:$0xf0]  ;;  %v1807_v5 = vld [vmem:[%s2942_s1 + $0xe4] sm:$0xf] }
   0x2   :  { %v1613_v2 = vld [vmem:[%s2942_s1 + $0x1e0] sm:$0xf]  ;;  %v1486_v3 = vor.u32 %v1809_v1, %v1485_v0  ;;  %v1841_v4 = vld [vmem:[%s2942_s1 + $0x1ec] sm:$0xf0]  ;;  %v1487_v6 = vld [vmem:[%s2942_s1 + $0xf0] sm:$0xf0] }
   0x3   :  { %v1614_v7 = vor.u32 %v1841_v4, %v1613_v2  ;;  %v1490_v8 = vor.u32 %v1807_v5, %v1487_v6  ;;  %v1839_v9 = vld [vmem:[%s2942_s1 + $0x1e4] sm:$0xf]  ;;  %v1615_v10 = vld [vmem:[%s2942_s1 + $0x1f0] sm:$0xf0]  ;;  %v1469_v11 = vld [vmem:[%s2942_s1 + $0xc0] sm:$0xf] }
   0x4   :  { %441 = vmatpush.bf16.msra.mxu0 %v1486_v3  ;;  %v1618_v12 = vor.u32 %v1839_v9, %v1615_v10  ;;  %v1805_v13 = vld [vmem:[%s2942_s1 + $0xcc] sm:$0xf0]  ;;  %v1597_v14 = vld [vmem:[%s2942_s1 + $0x1c0] sm:$0xf]  ;;  %v1803_v18 = vld [vmem:[%s2942_s1 + $0xc4] sm:$0xf] }
   0x5   :  { %v1837_v15 = vld [vmem:[%s2942_s1 + $0x1cc] sm:$0xf0]  ;;  %460 = vmatpush.bf16.msra.mxu1 %v1614_v7  ;;  %479 = vmatpush.bf16.msra.mxu2 %v1490_v8  ;;  %v1470_v16 = vor.u32 %v1805_v13, %v1469_v11  ;;  %v1471_v19 = vld [vmem:[%s2942_s1 + $0xd0] sm:$0xf0]  ;;  %v1835_v20 = vld [vmem:[%s2942_s1 + $0x1c4] sm:$0xf] }
   0x6   :  { %v1598_v17 = vor.u32 %v1837_v15, %v1597_v14  ;;  %498 = vmatpush.bf16.msra.mxu3 %v1618_v12  ;;  %v1474_v21 = vor.u32 %v1803_v18, %v1471_v19  ;;  %v1599_v22 = vld [vmem:[%s2942_s1 + $0x1d0] sm:$0xf0]  ;;  %v1453_v23 = vld [vmem:[%s2942_s1 + $0xa0] sm:$0xf]  ;;  %v1801_v24 = vld [vmem:[%s2942_s1 + $0xac] sm:$0xf0] }
   0x7   :  { %v1602_v25 = vor.u32 %v1835_v20, %v1599_v22  ;;  %v1581_v26 = vld [vmem:[%s2942_s1 + $0x1a0] sm:$0xf]  ;;  %v1833_v27 = vld [vmem:[%s2942_s1 + $0x1ac] sm:$0xf0]  ;;  %v1799_v28 = vld [vmem:[%s2942_s1 + $0xa4] sm:$0xf]  ;;  %v1454_v29 = vor.u32 %v1801_v24, %v1453_v23 }
   0x8   :  { %442 = vmatpush.bf16.msra.mxu0 %v1470_v16  ;;  %v1455_v30 = vld [vmem:[%s2942_s1 + $0xb0] sm:$0xf0]  ;;  %v1831_v31 = vld [vmem:[%s2942_s1 + $0x1a4] sm:$0xf]  ;;  %v1582_v33 = vor.u32 %v1833_v27, %v1581_v26  ;;  %v1437_v35 = vld [vmem:[%s2942_s1 + $0x80] sm:$0xf] }
   0x9   :  { %v1583_v32 = vld [vmem:[%s2942_s1 + $0x1b0] sm:$0xf0]  ;;  %461 = vmatpush.bf16.msra.mxu1 %v1598_v17  ;;  %480 = vmatpush.bf16.msra.mxu2 %v1474_v21  ;;  %v1458_v34 = vor.u32 %v1799_v28, %v1455_v30  ;;  %v1797_v36 = vld [vmem:[%s2942_s1 + $0x8c] sm:$0xf0]  ;;  %v1565_v37 = vld [vmem:[%s2942_s1 + $0x180] sm:$0xf] }
   0xa   :  { %499 = vmatpush.bf16.msra.mxu3 %v1602_v25  ;;  %v1586_v38 = vor.u32 %v1831_v31, %v1583_v32  ;;  %v1829_v39 = vld [vmem:[%s2942_s1 + $0x18c] sm:$0xf0]  ;;  %v1795_v40 = vld [vmem:[%s2942_s1 + $0x84] sm:$0xf]  ;;  %v1439_v41 = vld [vmem:[%s2942_s1 + $0x90] sm:$0xf0]  ;;  %v1438_v44 = vor.u32 %v1797_v36, %v1437_v35 }
   0xb   :  { %v1827_v42 = vld [vmem:[%s2942_s1 + $0x184] sm:$0xf]  ;;  %v1567_v43 = vld [vmem:[%s2942_s1 + $0x190] sm:$0xf0]  ;;  %v1566_v45 = vor.u32 %v1829_v39, %v1565_v37  ;;  %v1442_v46 = vor.u32 %v1795_v40, %v1439_v41  ;;  %v1421_v47 = vld [vmem:[%s2942_s1 + $0x60] sm:$0xf] }
   0xc   :  { %443 = vmatpush.bf16.msra.mxu0 %v1454_v29  ;;  %v1793_v48 = vld [vmem:[%s2942_s1 + $0x6c] sm:$0xf0]  ;;  %v1549_v49 = vld [vmem:[%s2942_s1 + $0x160] sm:$0xf]  ;;  %v1570_v50 = vor.u32 %v1827_v42, %v1567_v43  ;;  %v1791_v52 = vld [vmem:[%s2942_s1 + $0x64] sm:$0xf] }
   0xd   :  { %462 = vmatpush.bf16.msra.mxu1 %v1582_v33  ;;  %481 = vmatpush.bf16.msra.mxu2 %v1458_v34  ;;  %v1825_v51 = vld [vmem:[%s2942_s1 + $0x16c] sm:$0xf0]  ;;  %v1423_v53 = vld [vmem:[%s2942_s1 + $0x70] sm:$0xf0]  ;;  %v1823_v54 = vld [vmem:[%s2942_s1 + $0x164] sm:$0xf]  ;;  %v1422_v56 = vor.u32 %v1793_v48, %v1421_v47 }
   0xe   :  { %500 = vmatpush.bf16.msra.mxu3 %v1586_v38  ;;  %v1551_v55 = vld [vmem:[%s2942_s1 + $0x170] sm:$0xf0]  ;;  %v1550_v57 = vor.u32 %v1825_v51, %v1549_v49  ;;  %v1426_v58 = vor.u32 %v1791_v52, %v1423_v53  ;;  %v1405_v59 = vld [vmem:[%s2942_s1 + $0x40] sm:$0xf]  ;;  %v1789_v60 = vld [vmem:[%s2942_s1 + $0x4c] sm:$0xf0] }
   0xf   :  { %v1533_v61 = vld [vmem:[%s2942_s1 + $0x140] sm:$0xf]  ;;  %v1554_v62 = vor.u32 %v1823_v54, %v1551_v55  ;;  %v1821_v63 = vld [vmem:[%s2942_s1 + $0x14c] sm:$0xf0]  ;;  %v1787_v0 = vld [vmem:[%s2942_s1 + $0x44] sm:$0xf]  ;;  %v1406_v4 = vor.u32 %v1789_v60, %v1405_v59 }
  0x10   :  { %444 = vmatpush.bf16.msra.mxu0 %v1438_v44  ;;  %v1407_v1 = vld [vmem:[%s2942_s1 + $0x50] sm:$0xf0]  ;;  %v1819_v2 = vld [vmem:[%s2942_s1 + $0x144] sm:$0xf]  ;;  %v1534_v5 = vor.u32 %v1821_v63, %v1533_v61  ;;  %v1389_v7 = vld [vmem:[%s2942_s1 + $0x20] sm:$0xf] }
  0x11   :  { %463 = vmatpush.bf16.msra.mxu1 %v1566_v45  ;;  %482 = vmatpush.bf16.msra.mxu2 %v1442_v46  ;;  %v1535_v3 = vld [vmem:[%s2942_s1 + $0x150] sm:$0xf0]  ;;  %v1410_v6 = vor.u32 %v1787_v0, %v1407_v1  ;;  %v1785_v8 = vld [vmem:[%s2942_s1 + $0x2c] sm:$0xf0]  ;;  %v1517_v9 = vld [vmem:[%s2942_s1 + $0x120] sm:$0xf] }
  0x12   :  { %501 = vmatpush.bf16.msra.mxu3 %v1570_v50  ;;  %v1538_v10 = vor.u32 %v1819_v2, %v1535_v3  ;;  %v1817_v11 = vld [vmem:[%s2942_s1 + $0x12c] sm:$0xf0]  ;;  %v1783_v12 = vld [vmem:[%s2942_s1 + $0x24] sm:$0xf]  ;;  %v1391_v13 = vld [vmem:[%s2942_s1 + $0x30] sm:$0xf0]  ;;  %v1390_v16 = vor.u32 %v1785_v8, %v1389_v7 }
  0x13   :  { %v1815_v14 = vld [vmem:[%s2942_s1 + $0x124] sm:$0xf]  ;;  %v1519_v15 = vld [vmem:[%s2942_s1 + $0x130] sm:$0xf0]  ;;  %v1373_v17 = vld [vmem:[%s2942_s1] sm:$0xf]  ;;  %v1518_v19 = vor.u32 %v1817_v11, %v1517_v9  ;;  %v1394_v20 = vor.u32 %v1783_v12, %v1391_v13 }
  0x14   :  { %445 = vmatpush.bf16.msra.mxu0 %v1422_v56  ;;  %v1781_v18 = vld [vmem:[%s2942_s1 + $0xc] sm:$0xf0]  ;;  %v1501_v21 = vld [vmem:[%s2942_s1 + $0x100] sm:$0xf]  ;;  %v1779_v23 = vld [vmem:[%s2942_s1 + $0x4] sm:$0xf]  ;;  %v1522_v24 = vor.u32 %v1815_v14, %v1519_v15 }
  0x15   :  { %464 = vmatpush.bf16.msra.mxu1 %v1550_v57  ;;  %483 = vmatpush.bf16.msra.mxu2 %v1426_v58  ;;  %v1813_v22 = vld [vmem:[%s2942_s1 + $0x10c] sm:$0xf0]  ;;  %v1375_v25 = vld [vmem:[%s2942_s1 + $0x10] sm:$0xf0]  ;;  %v1811_v26 = vld [vmem:[%s2942_s1 + $0x104] sm:$0xf]  ;;  %v1374_v31 = vor.u32 %v1781_v18, %v1373_v17 }
  0x16   :  { %502 = vmatpush.bf16.msra.mxu3 %v1554_v62  ;;  %v1503_v27 = vld [vmem:[%s2942_s1 + $0x110] sm:$0xf0]  ;;  %v1357_v28 = vld [vmem:[%s2943_s0] sm:$0xf]  ;;  %v1808_v29 = vld [vmem:[%s2942_s1 + $0xec] sm:$0xf]  ;;  %v1502_v35 = vor.u32 %v1813_v22, %v1501_v21  ;;  %v1378_v36 = vor.u32 %v1779_v23, %v1375_v25 }
  0x17   :  { %v1495_v30 = vld [vmem:[%s2942_s1 + $0xf8] sm:$0xf0]  ;;  %v1776_v32 = vld [vmem:[%s2943_s0 + $0x4] sm:$0xf0]  ;;  %v1842_v34 = vld [vmem:[%s2942_s1 + $0x1f4] sm:$0xf0]  ;;  %v1506_v39 = vor.u32 %v1811_v26, %v1503_v27 }
  0x18   :  { %446 = vmatpush.bf16.msra.mxu0 %v1406_v4  ;;  %v1621_v33 = vld [vmem:[%s2942_s1 + $0x1e8] sm:$0xf]  ;;  %v1775_v37 = vld [vmem:[%s2943_s0 + $0x4] sm:$0xf]  ;;  %v1359_v38 = vld [vmem:[%s2943_s0 + $0x8] sm:$0xf0]  ;;  %v1498_v40 = vor.u32 %v1808_v29, %v1495_v30  ;;  %v2229_v44 = vor.u32 %v1776_v32, %v1357_v28 }
  0x19   :  { %465 = vmatpush.bf16.msra.mxu1 %v1534_v5  ;;  %484 = vmatpush.bf16.msra.mxu2 %v1410_v6  ;;  %v1493_v41 = vld [vmem:[%s2942_s1 + $0xe8] sm:$0xf]  ;;  %v1810_v42 = vld [vmem:[%s2942_s1 + $0xf4] sm:$0xf0]  ;;  %v1840_v43 = vld [vmem:[%s2942_s1 + $0x1ec] sm:$0xf]  ;;  %v1622_v45 = vor.u32 %v1842_v34, %v1621_v33  ;;  %v2240_v49 = vor.u32 %v1775_v37, %v1359_v38 }
  0x1a   :  { %503 = vmatpush.bf16.msra.mxu3 %v1538_v10  ;;  %v1623_v46 = vld [vmem:[%s2942_s1 + $0x1f8] sm:$0xf0]  ;;  %v1804_v47 = vld [vmem:[%s2942_s1 + $0xcc] sm:$0xf]  ;;  %v1605_v50 = vld [vmem:[%s2942_s1 + $0x1c8] sm:$0xf]  ;;  %v1494_v52 = vor.u32 %v1810_v42, %v1493_v41 }
  0x1b   :  { %v1479_v48 = vld [vmem:[%s2942_s1 + $0xd8] sm:$0xf0]  ;;  %v1838_v51 = vld [vmem:[%s2942_s1 + $0x1d4] sm:$0xf0]  ;;  %v1626_v53 = vor.u32 %v1840_v43, %v1623_v46  ;;  %v1477_v55 = vld [vmem:[%s2942_s1 + $0xc8] sm:$0xf] }
  0x1c   :  { %447 = vmatpush.bf16.msra.mxu0 %v1390_v16  ;;  %v1482_v54 = vor.u32 %v1804_v47, %v1479_v48  ;;  %v1806_v56 = vld [vmem:[%s2942_s1 + $0xd4] sm:$0xf0]  ;;  %v1836_v57 = vld [vmem:[%s2942_s1 + $0x1cc] sm:$0xf]  ;;  %v1606_v58 = vor.u32 %v1838_v51, %v1605_v50  ;;  %v1607_v59 = vld [vmem:[%s2942_s1 + $0x1d8] sm:$0xf0] }
  0x1d   :  { %466 = vmatpush.bf16.msra.mxu1 %v1518_v19  ;;  %485 = vmatpush.bf16.msra.mxu2 %v1394_v20  ;;  %v1800_v60 = vld [vmem:[%s2942_s1 + $0xac] sm:$0xf]  ;;  %v1463_v61 = vld [vmem:[%s2942_s1 + $0xb8] sm:$0xf0]  ;;  %v1589_v62 = vld [vmem:[%s2942_s1 + $0x1a8] sm:$0xf]  ;;  %v1478_v0 = vor.u32 %v1806_v56, %v1477_v55  ;;  %v1610_v1 = vor.u32 %v1836_v57, %v1607_v59 }
  0x1e   :  { %504 = vmatpush.bf16.msra.mxu3 %v1522_v24  ;;  %v1834_v63 = vld [vmem:[%s2942_s1 + $0x1b4] sm:$0xf0]  ;;  %v1466_v2 = vor.u32 %v1800_v60, %v1463_v61  ;;  %v1461_v3 = vld [vmem:[%s2942_s1 + $0xa8] sm:$0xf]  ;;  %v1832_v5 = vld [vmem:[%s2942_s1 + $0x1ac] sm:$0xf] }
  0x1f   :  { %v1802_v4 = vld [vmem:[%s2942_s1 + $0xb4] sm:$0xf0]  ;;  %v1590_v6 = vor.u32 %v1834_v63, %v1589_v62  ;;  %v1591_v7 = vld [vmem:[%s2942_s1 + $0x1b8] sm:$0xf0]  ;;  %v1796_v8 = vld [vmem:[%s2942_s1 + $0x8c] sm:$0xf] }
  0x20   :  { %448 = vmatpush.bf16.msra.mxu0 %v1374_v31  ;;  %v1447_v9 = vld [vmem:[%s2942_s1 + $0x98] sm:$0xf0]  ;;  %v1573_v10 = vld [vmem:[%s2942_s1 + $0x188] sm:$0xf]  ;;  %v1830_v11 = vld [vmem:[%s2942_s1 + $0x194] sm:$0xf0]  ;;  %v1462_v12 = vor.u32 %v1802_v4, %v1461_v3  ;;  %v1594_v14 = vor.u32 %v1832_v5, %v1591_v7 }
  0x21   :  { %467 = vmatpush.bf16.msra.mxu1 %v1502_v35  ;;  %486 = vmatpush.bf16.msra.mxu2 %v1378_v36  ;;  %v1445_v13 = vld [vmem:[%s2942_s1 + $0x88] sm:$0xf]  ;;  %v1450_v15 = vor.u32 %v1796_v8, %v1447_v9  ;;  %v1798_v16 = vld [vmem:[%s2942_s1 + $0x94] sm:$0xf0]  ;;  %v1828_v17 = vld [vmem:[%s2942_s1 + $0x18c] sm:$0xf]  ;;  %v1574_v19 = vor.u32 %v1830_v11, %v1573_v10 }
  0x22   :  { %505 = vmatpush.bf16.msra.mxu3 %v1506_v39  ;;  %v1575_v18 = vld [vmem:[%s2942_s1 + $0x198] sm:$0xf0]  ;;  %v1365_v20 = vld [vmem:[%s2943_s0 + $0x10] sm:$0xf]  ;;  %v1792_v21 = vld [vmem:[%s2942_s1 + $0x6c] sm:$0xf]  ;;  %v1446_v26 = vor.u32 %v1798_v16, %v1445_v13 }
  0x23   :  { %449 = vmatmul.bf16.vlgmr.msra.gmra.mxu0 %v2229_v44  ;;  %v1431_v22 = vld [vmem:[%s2942_s1 + $0x78] sm:$0xf0]  ;;  %v1778_v23 = vld [vmem:[%s2943_s0 + $0x14] sm:$0xf0]  ;;  %v1557_v24 = vld [vmem:[%s2942_s1 + $0x168] sm:$0xf]  ;;  %v1578_v29 = vor.u32 %v1828_v17, %v1575_v18 }
  0x24   :  { %468 = vmatmul.bf16.vlgmr.msra.gmra.mxu1 %v2240_v49  ;;  %487 = vmatmul.bf16.vlgmr.msra.gmra.mxu2 %v2229_v44  ;;  %v1826_v25 = vld [vmem:[%s2942_s1 + $0x174] sm:$0xf0]  ;;  %v1777_v27 = vld [vmem:[%s2943_s0 + $0x14] sm:$0xf]  ;;  %v1367_v28 = vld [vmem:[%s2943_s0 + $0x18] sm:$0xf0]  ;;  %v1434_v30 = vor.u32 %v1792_v21, %v1431_v22  ;;  %v2345_v34 = vor.u32 %v1778_v23, %v1365_v20 }
  0x25   :  { %555 = vmatpush.bf16.msrb.mxu2 %v1498_v40  ;;  %536 = vmatpush.bf16.msrb.mxu1 %v1622_v45  ;;  %v1429_v31 = vld [vmem:[%s2942_s1 + $0x68] sm:$0xf]  ;;  %v1794_v32 = vld [vmem:[%s2942_s1 + $0x74] sm:$0xf0]  ;;  %v1824_v33 = vld [vmem:[%s2942_s1 + $0x16c] sm:$0xf]  ;;  %v1558_v35 = vor.u32 %v1826_v25, %v1557_v24  ;;  %v2356_v39 = vor.u32 %v1777_v27, %v1367_v28 }
  0x26   :  { %506 = vmatmul.bf16.vlgmr.msra.gmra.mxu3 %v2240_v49  ;;  %517 = vmatpush.bf16.msrb.mxu0 %v1494_v52  ;;  %v1559_v36 = vld [vmem:[%s2942_s1 + $0x178] sm:$0xf0]  ;;  %v1788_v37 = vld [vmem:[%s2942_s1 + $0x4c] sm:$0xf]  ;;  %v1541_v40 = vld [vmem:[%s2942_s1 + $0x148] sm:$0xf]  ;;  %v1430_v42 = vor.u32 %v1794_v32, %v1429_v31 }
  0x27   :  { %574 = vmatpush.bf16.msrb.mxu3 %v1626_v53  ;;  %v1415_v38 = vld [vmem:[%s2942_s1 + $0x58] sm:$0xf0]  ;;  %v1822_v41 = vld [vmem:[%s2942_s1 + $0x154] sm:$0xf0]  ;;  %v1562_v43 = vor.u32 %v1824_v33, %v1559_v36  ;;  %v1413_v46 = vld [vmem:[%s2942_s1 + $0x48] sm:$0xf] }
  0x28   :  { %v1418_v45 = vor.u32 %v1788_v37, %v1415_v38  ;;  %v1790_v47 = vld [vmem:[%s2942_s1 + $0x54] sm:$0xf0]  ;;  %v1820_v48 = vld [vmem:[%s2942_s1 + $0x14c] sm:$0xf]  ;;  %v1542_v50 = vor.u32 %v1822_v41, %v1541_v40  ;;  %v1543_v51 = vld [vmem:[%s2942_s1 + $0x158] sm:$0xf0] }
  0x29   :  { %556 = vmatpush.bf16.msrb.mxu2 %v1482_v54  ;;  %537 = vmatpush.bf16.msrb.mxu1 %v1606_v58  ;;  %v1784_v52 = vld [vmem:[%s2942_s1 + $0x2c] sm:$0xf]  ;;  %v1399_v53 = vld [vmem:[%s2942_s1 + $0x38] sm:$0xf0]  ;;  %v1525_v54 = vld [vmem:[%s2942_s1 + $0x128] sm:$0xf]  ;;  %v1414_v56 = vor.u32 %v1790_v47, %v1413_v46  ;;  %v1546_v57 = vor.u32 %v1820_v48, %v1543_v51 }
  0x2a   :  { %518 = vmatpush.bf16.msrb.mxu0 %v1478_v0  ;;  %v1818_v55 = vld [vmem:[%s2942_s1 + $0x134] sm:$0xf0]  ;;  %v1402_v58 = vor.u32 %v1784_v52, %v1399_v53  ;;  %v1397_v59 = vld [vmem:[%s2942_s1 + $0x28] sm:$0xf]  ;;  %v1816_v61 = vld [vmem:[%s2942_s1 + $0x12c] sm:$0xf] }
  0x2b   :  { %575 = vmatpush.bf16.msrb.mxu3 %v1610_v1  ;;  %v1786_v60 = vld [vmem:[%s2942_s1 + $0x34] sm:$0xf0]  ;;  %v1526_v62 = vor.u32 %v1818_v55, %v1525_v54  ;;  %v1527_v63 = vld [vmem:[%s2942_s1 + $0x138] sm:$0xf0]  ;;  %v1780_v0 = vld [vmem:[%s2942_s1 + $0xc] sm:$0xf] }
  0x2c   :  { %v1383_v1 = vld [vmem:[%s2942_s1 + $0x18] sm:$0xf0]  ;;  %v1814_v3 = vld [vmem:[%s2942_s1 + $0x114] sm:$0xf0]  ;;  %v1398_v4 = vor.u32 %v1786_v60, %v1397_v59  ;;  %v1530_v5 = vor.u32 %v1816_v61, %v1527_v63  ;;  %v1381_v7 = vld [vmem:[%s2942_s1 + $0x8] sm:$0xf] }
  0x2d   :  { %557 = vmatpush.bf16.msrb.mxu2 %v1466_v2  ;;  %538 = vmatpush.bf16.msrb.mxu1 %v1590_v6  ;;  %v1509_v2 = vld [vmem:[%s2942_s1 + $0x108] sm:$0xf]  ;;  %v1386_v6 = vor.u32 %v1780_v0, %v1383_v1  ;;  %v1782_v8 = vld [vmem:[%s2942_s1 + $0x14] sm:$0xf0]  ;;  %v1812_v10 = vld [vmem:[%s2942_s1 + $0x10c] sm:$0xf] }
  0x2e   :  { %519 = vmatpush.bf16.msrb.mxu0 %v1462_v12  ;;  %v1510_v9 = vor.u32 %v1814_v3, %v1509_v2  ;;  %v1511_v11 = vld [vmem:[%s2942_s1 + $0x118] sm:$0xf0]  ;;  %v1382_v12 = vor.u32 %v1782_v8, %v1381_v7  ;;  %v2451_v16 = vld [vmem:[%s2946_s2] sm:$0xf]  ;;  %v1857_v17 = vld [vmem:[%s2944_s3 + $0x70] sm:$0xff] }
  0x2f   :  { %576 = vmatpush.bf16.msrb.mxu3 %v1594_v14  ;;  %v1514_v13 = vor.u32 %v1812_v10, %v1511_v11  ;;  %v1850_v14 = vld [vmem:[%s2944_s3 + $0x38] sm:$0xff]  ;;  %v2457_v18 = vperm.slane %v2451_v16, 0  ;;  %v1856_v20 = vld [vmem:[%s2944_s3 + $0x68] sm:$0xff]  ;;  %v2469_v25 = vperm.slane %v2451_v16, 1  ;;  %v1845_v37 = vld [vmem:[%s2944_s3 + $0x10] sm:$0xff] }
  0x30   :  { %v1846_v28 = vld [vmem:[%s2944_s3 + $0x18] sm:$0xff]  ;;  %v1853_v52 = vld [vmem:[%s2944_s3 + $0x50] sm:$0xff]  ;;  %v1843_v55 = vld [vmem:[%s2944_s3] sm:$0xff] }
  0x31   :  { %558 = vmatpush.bf16.msrb.mxu2 %v1450_v15  ;;  %539 = vmatpush.bf16.msrb.mxu1 %v1574_v19  ;;  %v1849_v15 = vld [vmem:[%s2944_s3 + $0x30] sm:$0xff]  ;;  %v1847_v19 = vld [vmem:[%s2944_s3 + $0x20] sm:$0xff]  ;;  %v1854_v41 = vld [vmem:[%s2944_s3 + $0x58] sm:$0xff] }
  0x32   :  { %520 = vmatpush.bf16.msrb.mxu0 %v1446_v26  ;;  %v1852_v60 = vld [vmem:[%s2944_s3 + $0x48] sm:$0xff]  ;;  %v1866_v2 = vld [vmem:[%s2944_s3 + $0xb8] sm:$0xff] }
  0x33   :  { %577 = vmatpush.bf16.msrb.mxu3 %v1578_v29  ;;  %454 = vmatmul.bf16.gmra.mxu0 %v2345_v34 }
  0x34   :  { %473 = vmatmul.bf16.gmra.mxu1 %v2356_v39  ;;  %492 = vmatmul.bf16.gmra.mxu2 %v2345_v34 }
  0x35   :  { %559 = vmatpush.bf16.msrb.mxu2 %v1434_v30  ;;  %540 = vmatpush.bf16.msrb.mxu1 %v1558_v35 }
  0x36   :  { %511 = vmatmul.bf16.gmra.mxu3 %v2356_v39  ;;  %521 = vmatpush.bf16.msrb.mxu0 %v1430_v42 }
  0x37   :  { %578 = vmatpush.bf16.msrb.mxu3 %v1562_v43 }
  0x39   :  { %560 = vmatpush.bf16.msrb.mxu2 %v1418_v45  ;;  %541 = vmatpush.bf16.msrb.mxu1 %v1542_v50  ;;  %v1844_v45 = vld [vmem:[%s2944_s3 + $0x8] sm:$0xff] }
  0x3a   :  { %522 = vmatpush.bf16.msrb.mxu0 %v1414_v56 }
  0x3b   :  { %579 = vmatpush.bf16.msrb.mxu3 %v1546_v57 }
  0x3d   :  { %561 = vmatpush.bf16.msrb.mxu2 %v1402_v58  ;;  %542 = vmatpush.bf16.msrb.mxu1 %v1526_v62 }
  0x3e   :  { %523 = vmatpush.bf16.msrb.mxu0 %v1398_v4 }
  0x3f   :  { %580 = vmatpush.bf16.msrb.mxu3 %v1530_v5 }
  0x41   :  { %562 = vmatpush.bf16.msrb.mxu2 %v1386_v6  ;;  %543 = vmatpush.bf16.msrb.mxu1 %v1510_v9  ;;  %v1851_v6 = vld [vmem:[%s2944_s3 + $0x40] sm:$0xff] }
  0x42   :  { %524 = vmatpush.bf16.msrb.mxu0 %v1382_v12  ;;  %v1865_v12 = vld [vmem:[%s2944_s3 + $0xb0] sm:$0xff] }
  0x43   :  { %581 = vmatpush.bf16.msrb.mxu3 %v1514_v13 }
  0x44   :  { %544 = vmatmul.bf16.vlgmr.msrb.gmra.mxu1 %v2240_v49  ;;  %563 = vmatmul.bf16.vlgmr.msrb.gmra.mxu2 %v2229_v44 }
  0x45   :  { %525 = vmatmul.bf16.vlgmr.msrb.gmra.mxu0 %v2229_v44  ;;  %v1858_v44 = vld [vmem:[%s2944_s3 + $0x78] sm:$0xff]  ;;  %1219 = vmatpush.bf16.msra.mxu2 %v1866_v2 }
  0x46   :  { %582 = vmatmul.bf16.vlgmr.msrb.gmra.mxu3 %v2240_v49  ;;  %1181 = vmatpush.bf16.msra.mxu0 %v1850_v14  ;;  %v1848_v49 = vld [vmem:[%s2944_s3 + $0x28] sm:$0xff] }
  0x47   :  { %1200 = vmatpush.bf16.msra.mxu1 %v1858_v44 }
  0x49   :  { %1220 = vmatpush.bf16.msra.mxu2 %v1865_v12  ;;  %v1863_v12 = vld [vmem:[%s2944_s3 + $0xa0] sm:$0xff] }
  0x4a   :  { %1182 = vmatpush.bf16.msra.mxu0 %v1849_v15 }
  0x4b   :  { %1201 = vmatpush.bf16.msra.mxu1 %v1857_v17  ;;  %v1874_v17 = vld [vmem:[%s2944_s3 + $0xf8] sm:$0xff] }
  0x4c   :  { %1238 = vmatpush.bf16.msra.mxu3 %v1874_v17 }
  0x4e   :  { %1183 = vmatpush.bf16.msra.mxu0 %v1848_v49 }
  0x4f   :  { %1202 = vmatpush.bf16.msra.mxu1 %v1856_v20 }
  0x52   :  { %1184 = vmatpush.bf16.msra.mxu0 %v1847_v19 }
  0x54   :  { %549 = vmatmul.bf16.gmra.mxu1 %v2356_v39  ;;  %568 = vmatmul.bf16.gmra.mxu2 %v2345_v34 }
  0x55   :  { %530 = vmatmul.bf16.gmra.mxu0 %v2345_v34  ;;  %v1855_v34 = vld [vmem:[%s2944_s3 + $0x60] sm:$0xff] }
  0x56   :  { %587 = vmatmul.bf16.gmra.mxu3 %v2356_v39  ;;  %1185 = vmatpush.bf16.msra.mxu0 %v1846_v28 }
  0x57   :  { %1203 = vmatpush.bf16.msra.mxu1 %v1855_v34 }
  0x5a   :  { %1186 = vmatpush.bf16.msra.mxu0 %v1845_v37 }
  0x5b   :  { %1204 = vmatpush.bf16.msra.mxu1 %v1854_v41 }
  0x5e   :  { %1187 = vmatpush.bf16.msra.mxu0 %v1844_v45 }
  0x5f   :  { %1205 = vmatpush.bf16.msra.mxu1 %v1853_v52  ;;  %v1864_v52 = vld [vmem:[%s2944_s3 + $0xa8] sm:$0xff] }
  0x60   :  { %1221 = vmatpush.bf16.msra.mxu2 %v1864_v52 }
  0x62   :  { %1188 = vmatpush.bf16.msra.mxu0 %v1843_v55 }
  0x63   :  { %1206 = vmatpush.bf16.msra.mxu1 %v1852_v60 }
  0x64   :  { %1222 = vmatpush.bf16.msra.mxu2 %v1863_v12 }
  0x67   :  { %1207 = vmatpush.bf16.msra.mxu1 %v1851_v6 }
  0xa0   :  { %v450_v21 = vpop.f32.mrf.mxu0 }
  0xa1   :  { %v451_v22 = vadd.f32 %v450_v21, %v2457_v18  ;;  %v469_v23 = vpop.f32.mrf.mxu1  ;;  %v2554_v21 = vperm.slane %v2451_v16, 2 }
  0xa3   :  { %v2466_v24 = vadd.f32 %v469_v23, %v451_v22 }
  0xa5   :  { %v1627_v26 = vmul.f32 -1.442695, %v2466_v24 }
  0xa7   :  { %1888 = vpow2.f32 %v1627_v26  ;;  %v488_v27 = vpop.f32.mrf.mxu2 }
  0xa8   :  { %v489_v29 = vadd.f32 %v488_v27, %v2469_v25  ;;  %v452_v31 = vpop.f32.mrf.mxu0 }
  0xa9   :  { %v507_v30 = vpop.f32.mrf.mxu3  ;;  %v453_v32 = vadd.f32 %v452_v31, %v2457_v18  ;;  %v471_v33 = vpop.f32.mrf.mxu1 }
  0xaa   :  { %v2480_v35 = vadd.f32 %v507_v30, %v489_v29  ;;  %v1862_v30 = vld [vmem:[%s2944_s3 + $0x98] sm:$0xff] }
  0xab   :  { %v2482_v36 = vadd.f32 %v471_v33, %v453_v32  ;;  %1223 = vmatpush.bf16.msra.mxu2 %v1862_v30 }
  0xac   :  { %v1628_v38 = vmul.f32 -1.442695, %v2480_v35 }
  0xad   :  { %v1889_v39 = vpop.eup %1888  ;;  %v1631_v40 = vmul.f32 -1.442695, %v2482_v36 }
  0xae   :  { %v2492_v42 = vadd.f32 1.0, %v1889_v39  ;;  %1890 = vpow2.f32 %v1628_v38 }
  0xaf   :  { %1892 = vpow2.f32 %v1631_v40  ;;  %v490_v43 = vpop.f32.mrf.mxu2 }
  0xb0   :  { %1894 = vrcp.f32 %v2492_v42  ;;  %v455_v47 = vpop.f32.mrf.mxu0  ;;  %v491_v48 = vadd.f32 %v490_v43, %v2469_v25  ;;  %v666_v10 = vand.u32 2147483647, %v2492_v42  ;;  %v668_v13 = vand.u32 2147483648, %v2492_v42 }
  0xb1   :  { %v509_v46 = vpop.f32.mrf.mxu3  ;;  %v456_v50 = vadd.f32 %v455_v47, %v2457_v18  ;;  %v474_v51 = vpop.f32.mrf.mxu1  ;;  %vm662_vm1 = vweird.f32 %v2492_v42 }
  0xb2   :  { %v2503_v53 = vadd.f32 %v509_v46, %v491_v48  ;;  %vm2557_vm2 = vcmp.eq.f32.partialorder %v666_v10, 8.507059e+37  ;;  %v669_v31 = vor.u32 1.1754944e-38, %v668_v13 }
  0xb3   :  { %v2505_v54 = vadd.f32 %v474_v51, %v456_v50  ;;  %v2587_v51 = vperm.slane %v2451_v16, 3 }
  0xb4   :  { %v1891_v56 = vpop.eup %1890  ;;  %v1632_v59 = vmul.f32 -1.442695, %v2503_v53 }
  0xb5   :  { %v1893_v57 = vpop.eup %1892  ;;  %v2510_v58 = vadd.f32 1.0, %v1891_v56  ;;  %v1635_v63 = vmul.f32 -1.442695, %v2505_v54 }
  0xb6   :  { %v2516_v61 = vpop.eup %1894  ;;  %v2518_v62 = vadd.f32 1.0, %v1893_v57 }
  0xb7   :  { %v658_v0 = vmul.f32 %v2516_v61, %v2492_v42  ;;  %1896 = vrcp.f32 %v2510_v58  ;;  %v493_v1 = vpop.f32.mrf.mxu2  ;;  %vm663_vm0 = vweird.f32 %v2516_v61  ;;  %v683_v42 = vand.u32 2147483648, %v2510_v58 }
  0xb8   :  { %1898 = vrcp.f32 %v2518_v62  ;;  %v457_v4 = vpop.f32.mrf.mxu0  ;;  %v494_v7 = vadd.f32 %v493_v1, %v2469_v25  ;;  %vm2565_vm3 = vmor %vm662_vm1, %vm663_vm0  ;;  %v728_v43 = vand.u32 2147483648, %v2518_v62  ;;  %v726_v46 = vand.u32 2147483647, %v2518_v62 }
  0xb9   :  { %v512_v3 = vpop.f32.mrf.mxu3  ;;  %v659_v5 = vsub.f32 1.0, %v658_v0  ;;  %1900 = vpow2.f32 %v1632_v59  ;;  %v476_v8 = vpop.f32.mrf.mxu1  ;;  %v458_v11 = vadd.f32 %v457_v4, %v2457_v18  ;;  %vm677_vm6 = vweird.f32 %v2510_v58 }
  0xba   :  { %1902 = vpow2.f32 %v1635_v63  ;;  %v2539_v14 = vadd.f32 %v512_v3, %v494_v7  ;;  %vm722_vm7 = vweird.f32 %v2518_v62  ;;  %v681_v59 = vand.u32 2147483647, %v2510_v58  ;;  %v1873_v63 = vld [vmem:[%s2944_s3 + $0xf0] sm:$0xff] }
  0xbb   :  { %v660_v9 = vmul.f32 %v2516_v61, %v659_v5  ;;  %v2545_v49 = vadd.f32 %v476_v8, %v458_v11  ;;  %v684_v60 = vor.u32 1.1754944e-38, %v683_v42  ;;  %vm727_vm10 = vcmp.eq.f32.partialorder %v726_v46, 8.507059e+37  ;;  %1239 = vmatpush.bf16.msra.mxu3 %v1873_v63 }
  0xbc   :  { %v1636_v20 = vmul.f32 -1.442695, %v2539_v14  ;;  %vm682_vm11 = vcmp.eq.f32.partialorder %v681_v59, 8.507059e+37 }
  0xbd   :  { %v2541_v15 = vpop.eup %1896  ;;  %v661_v44 = vadd.f32 %v2516_v61, %v660_v9  ;;  %v1639_v27 = vmul.f32 -1.442695, %v2545_v49 }
  0xbe   :  { %v1899_v18 = vpop.eup %1898  ;;  %v673_v19 = vmul.f32 %v2541_v15, %v2510_v58  ;;  %1904 = vpow2.f32 %v1636_v20  ;;  %vm678_vm5 = vweird.f32 %v2541_v15  ;;  %v1872_v20 = vld [vmem:[%s2944_s3 + $0xe8] sm:$0xff] }
  0xbf   :  { %v1901_v22 = vpop.eup %1900  ;;  %v718_v26 = vmul.f32 %v1899_v18, %v2518_v62  ;;  %v495_v28 = vpop.f32.mrf.mxu2  ;;  %v665_v37 = vsel %vm2565_vm3, %v2516_v61, %v661_v44  ;;  %1906 = vpow2.f32 %v1639_v27  ;;  %vm723_vm4 = vweird.f32 %v1899_v18  ;;  %vm2604_vm9 = vmor %vm677_vm6, %vm678_vm5  ;;  %1240 = vmatpush.bf16.msra.mxu3 %v1872_v20  ;;  %v1869_v20 = vld [vmem:[%s2944_s3 + $0xd0] sm:$0xff] }
  0xc0   :  { %v1903_v29 = vpop.eup %1902  ;;  %v674_v32 = vsub.f32 1.0, %v673_v19  ;;  %v2569_v33 = vadd.f32 1.0, %v1901_v22  ;;  %v670_v47 = vsel %vm2557_vm2, %v669_v31, %v665_v37  ;;  %v496_v56 = vadd.f32 %v495_v28, %v2469_v25  ;;  %vm724_vm8 = vmor %vm722_vm7, %vm723_vm4  ;;  %v1870_v25 = vld [vmem:[%s2944_s3 + $0xd8] sm:$0xff] }
  0xc1   :  { %v514_v34 = vpop.f32.mrf.mxu3  ;;  %v719_v38 = vsub.f32 1.0, %v718_v26  ;;  %v2574_v39 = vadd.f32 1.0, %v1903_v29  ;;  %v545_v50 = vpop.f32.mrf.mxu1  ;;  %v729_v61 = vor.u32 1.1754944e-38, %v728_v43  ;;  %v897_v1 = vmul.f32 %v670_v47, %v2466_v24 }
  0xc2   :  { %v526_v40 = vpop.f32.mrf.mxu0  ;;  %v675_v41 = vmul.f32 %v2541_v15, %v674_v32  ;;  %1908 = vrcp.f32 %v2569_v33  ;;  %v741_v5 = vand.u32 2147483647, %v2569_v33  ;;  %v2624_v10 = vadd.f32 %v514_v34, %v496_v56  ;;  %v1861_v56 = vld [vmem:[%s2944_s3 + $0x90] sm:$0xff] }
  0xc3   :  { %v720_v45 = vmul.f32 %v1899_v18, %v719_v38  ;;  %1910 = vrcp.f32 %v2574_v39  ;;  %v527_v16 = vadd.f32 %v526_v40, %v2554_v21  ;;  %v743_v13 = vand.u32 2147483648, %v2569_v33  ;;  %1224 = vmatpush.bf16.msra.mxu2 %v1861_v56 }
  0xc4   :  { %v676_v48 = vadd.f32 %v2541_v15, %v675_v41  ;;  %v1905_v57 = vpop.eup %1904  ;;  %vm737_vm12 = vweird.f32 %v2569_v33  ;;  %vm2639_vm13 = vcmp.eq.f32.partialorder %v741_v5, 8.507059e+37  ;;  %v786_v26 = vand.u32 2147483647, %v2574_v39 }
  0xc5   :  { %v721_v55 = vadd.f32 %v1899_v18, %v720_v45  ;;  %v1907_v0 = vpop.eup %1906  ;;  %v2608_v62 = vadd.f32 1.0, %v1905_v57  ;;  %v2632_v44 = vadd.f32 %v545_v50, %v527_v16  ;;  %v788_v28 = vand.u32 2147483648, %v2574_v39 }
  0xc6   :  { %v680_v3 = vsel %vm2604_vm9, %v2541_v15, %v676_v48  ;;  %v2616_v24 = vadd.f32 1.0, %v1907_v0  ;;  %v1640_v29 = vmul.f32 -1.442695, %v2624_v10  ;;  %v744_v32 = vor.u32 1.1754944e-38, %v743_v13 }
  0xc7   :  { %v725_v58 = vsel %vm724_vm8, %v1899_v18, %v721_v55  ;;  %v564_v6 = vpop.f32.mrf.mxu2  ;;  %1912 = vrcp.f32 %v2608_v62  ;;  %v685_v17 = vsel %vm682_vm11, %v684_v60, %v680_v3  ;;  %vm782_vm15 = vweird.f32 %v2574_v39 }
  0xc8   :  { %v2610_v2 = vpop.eup %1908  ;;  %v730_v4 = vsel %vm727_vm10, %v729_v61, %v725_v58  ;;  %1914 = vrcp.f32 %v2616_v24  ;;  %v898_v31 = vmul.f32 %v685_v17, %v2480_v35  ;;  %v1629_v34 = vmul.f32 -1.442695, %v2632_v44  ;;  %v1871_v35 = vld [vmem:[%s2944_s3 + $0xe0] sm:$0xff] }
  0xc9   :  { %v2618_v7 = vpop.eup %1910  ;;  %v901_v8 = vmul.f32 %v730_v4, %v2482_v36  ;;  %v733_v9 = vmul.f32 %v2610_v2, %v2569_v33  ;;  %v583_v36 = vpop.f32.mrf.mxu3  ;;  %vm738_vm14 = vweird.f32 %v2610_v2  ;;  %v565_v37 = vadd.f32 %v564_v6, %v2587_v51  ;;  %1241 = vmatpush.bf16.msra.mxu3 %v1871_v35 }
  0xca   :  { %v528_v11 = vpop.f32.mrf.mxu0  ;;  %v778_v15 = vmul.f32 %v2618_v7, %v2574_v39  ;;  %v547_v38 = vpop.f32.mrf.mxu1  ;;  %1916 = vpow2.f32 %v1640_v29  ;;  %vm739_vm0 = vmor %vm737_vm12, %vm738_vm14  ;;  %vm783_vm1 = vweird.f32 %v2618_v7  ;;  %v846_v46 = vand.u32 2147483647, %v2616_v24 }
  0xcb   :  { %v913_v18 = vpack.c.bf16 %v901_v8, %v897_v1  ;;  %v734_v19 = vsub.f32 1.0, %v733_v9  ;;  %v529_v43 = vadd.f32 %v528_v11, %v2554_v21  ;;  %1918 = vpow2.f32 %v1629_v34  ;;  %v1860_v9 = vld [vmem:[%s2944_s3 + $0x88] sm:$0xff]  ;;  %vm2711_vm4 = vmor %vm782_vm15, %vm783_vm1 }
  0xcc   :  { %v779_v23 = vsub.f32 1.0, %v778_v15  ;;  %v2674_v52 = vadd.f32 %v583_v36, %v565_v37  ;;  %v848_v61 = vand.u32 2147483648, %v2616_v24  ;;  %vm797_vm5 = vweird.f32 %v2608_v62  ;;  %1225 = vmatpush.bf16.msra.mxu2 %v1860_v9 }
  0xcd   :  { %v735_v27 = vmul.f32 %v2610_v2, %v734_v19  ;;  %1189 = vmatmul.bf16.vlgmr.msra.gmra.mxu0 %v913_v18  ;;  %v2655_v40 = vpop.eup %1912  ;;  %v2676_v55 = vadd.f32 %v547_v38, %v529_v43  ;;  %1242 = vmatpush.bf16.msra.mxu3 %v1870_v25  ;;  %v801_v17 = vand.u32 2147483647, %v2608_v62  ;;  %v803_v18 = vand.u32 2147483648, %v2608_v62 }
  0xce   :  { %v780_v42 = vmul.f32 %v2618_v7, %v779_v23  ;;  %v793_v45 = vmul.f32 %v2655_v40, %v2608_v62  ;;  %v2671_v48 = vpop.eup %1914  ;;  %vm798_vm2 = vweird.f32 %v2655_v40  ;;  %v1630_v1 = vmul.f32 -1.442695, %v2674_v52 }
  0xcf   :  { %v736_v41 = vadd.f32 %v2610_v2, %v735_v27  ;;  %v566_v47 = vpop.f32.mrf.mxu2  ;;  %v838_v60 = vmul.f32 %v2671_v48, %v2616_v24  ;;  %vm843_vm3 = vweird.f32 %v2671_v48  ;;  %v1633_v3 = vmul.f32 -1.442695, %v2676_v55  ;;  %vm2725_vm6 = vmor %vm797_vm5, %vm798_vm2 }
  0xd0   :  { %v567_v33 = vadd.f32 %v566_v47, %v2587_v51  ;;  %v794_v59 = vsub.f32 1.0, %v793_v45  ;;  %v781_v0 = vadd.f32 %v2618_v7, %v780_v42  ;;  %1920 = vpow2.f32 %v1630_v1 }
  0xd1   :  { %v740_v50 = vsel %vm739_vm0, %v2610_v2, %v736_v41  ;;  %v839_v2 = vsub.f32 1.0, %v838_v60  ;;  %v585_v4 = vpop.f32.mrf.mxu3  ;;  %1922 = vpow2.f32 %v1633_v3  ;;  %vm842_vm7 = vweird.f32 %v2616_v24  ;;  %1243 = vmatpush.bf16.msra.mxu3 %v1869_v20 }
  0xd2   :  { %v745_v57 = vsel %vm2639_vm13, %v744_v32, %v740_v50  ;;  %v531_v16 = vpop.f32.mrf.mxu0  ;;  %v795_v58 = vmul.f32 %v2655_v40, %v794_v59  ;;  %v2697_v6 = vadd.f32 %v585_v4, %v567_v33  ;;  %v550_v27 = vpop.f32.mrf.mxu1  ;;  %v785_v29 = vsel %vm2711_vm4, %v2618_v7, %v781_v0  ;;  %vm844_vm8 = vmor %vm842_vm7, %vm843_vm3  ;;  %v1859_v32 = vld [vmem:[%s2944_s3 + $0x80] sm:$0xff] }
  0xd3   :  { %v902_v63 = vmul.f32 %v745_v57, %v2503_v53  ;;  %v1917_v53 = vpop.eup %1916  ;;  %v532_v8 = vadd.f32 %v531_v16, %v2554_v21  ;;  %v840_v13 = vmul.f32 %v2671_v48, %v839_v2  ;;  %v849_v30 = vor.u32 1.1754944e-38, %v848_v61  ;;  %1226 = vmatpush.bf16.msra.mxu2 %v1859_v32 }
  0xd4   :  { %v1919_v11 = vpop.eup %1918  ;;  %v796_v12 = vadd.f32 %v2655_v40, %v795_v58  ;;  %v2705_v15 = vadd.f32 1.0, %v1917_v53  ;;  %v1634_v62 = vmul.f32 -1.442695, %v2697_v6  ;;  %v789_v34 = vor.u32 1.1754944e-38, %v788_v28  ;;  %v1868_v28 = vld [vmem:[%s2944_s3 + $0xc8] sm:$0xff] }
  0xd5   :  { %v914_v5 = vpack.c.bf16 %v902_v63, %v898_v31  ;;  %v2718_v19 = vadd.f32 1.0, %v1919_v11  ;;  %v841_v23 = vadd.f32 %v2671_v48, %v840_v13  ;;  %v2739_v31 = vadd.f32 %v550_v27, %v532_v8  ;;  %1244 = vmatpush.bf16.msra.mxu3 %v1868_v28 }
  0xd6   :  { %1924 = vrcp.f32 %v2705_v15  ;;  %v800_v7 = vsel %vm2725_vm6, %v2655_v40, %v796_v12  ;;  %vm847_vm9 = vcmp.eq.f32.partialorder %v846_v46, 8.507059e+37  ;;  %v1921_v38 = vpop.eup %1920  ;;  %vm787_vm10 = vcmp.eq.f32.partialorder %v786_v26, 8.507059e+37 }
  0xd7   :  { %1208 = vmatmul.bf16.vlgmr.msra.gmra.mxu1 %v914_v5  ;;  %1926 = vrcp.f32 %v2718_v19  ;;  %v845_v37 = vsel %vm844_vm8, %v2671_v48, %v841_v23  ;;  %v804_v41 = vor.u32 1.1754944e-38, %v803_v18  ;;  %v1923_v43 = vpop.eup %1922  ;;  %v790_v35 = vsel %vm787_vm10, %v789_v34, %v785_v29  ;;  %v569_v45 = vpop.f32.mrf.mxu2 }
  0xd8   :  { %v850_v42 = vsel %vm847_vm9, %v849_v30, %v845_v37  ;;  %vm802_vm11 = vcmp.eq.f32.partialorder %v801_v17, 8.507059e+37  ;;  %v2757_v40 = vadd.f32 1.0, %v1921_v38  ;;  %1928 = vpow2.f32 %v1634_v62 }
  0xd9   :  { %v805_v24 = vsel %vm802_vm11, %v804_v41, %v800_v7  ;;  %v2759_v46 = vadd.f32 1.0, %v1923_v43  ;;  %v1637_v39 = vmul.f32 -1.442695, %v2739_v31  ;;  %v909_v47 = vmul.f32 %v850_v42, %v2545_v49  ;;  %v1867_v49 = vld [vmem:[%s2944_s3 + $0xc0] sm:$0xff]  ;;  %v588_v2 = vpop.f32.mrf.mxu3 }
  0xda   :  { %v861_v48 = vand.u32 2147483647, %v2705_v15  ;;  %v863_v50 = vand.u32 2147483648, %v2705_v15  ;;  %1930 = vrcp.f32 %v2757_v40  ;;  %v905_v56 = vmul.f32 %v790_v35, %v2505_v54  ;;  %1245 = vmatpush.bf16.msra.mxu3 %v1867_v49  ;;  %v533_v3 = vpop.f32.mrf.mxu0 }
  0xdb   :  { %1932 = vrcp.f32 %v2759_v46  ;;  %v570_v59 = vadd.f32 %v569_v45, %v2587_v51  ;;  %vm857_vm12 = vweird.f32 %v2705_v15  ;;  %v696_v61 = vand.u32 2147483647, %v2718_v19 }
  0xdc   :  { %v1925_v26 = vpop.eup %1924  ;;  %v698_v16 = vand.u32 2147483648, %v2718_v19  ;;  %v2781_v54 = vmul.f32 %v805_v24, %v2539_v14  ;;  %vm692_vm13 = vweird.f32 %v2718_v19  ;;  %1934 = vpow2.f32 %v1637_v39 }
  0xdd   :  { %v2766_v33 = vpop.eup %1926  ;;  %v853_v57 = vmul.f32 %v1925_v26, %v2705_v15  ;;  %vm2784_vm14 = vcmp.eq.f32.partialorder %v861_v48, 8.507059e+37  ;;  %v864_v25 = vor.u32 1.1754944e-38, %v863_v50  ;;  %v917_v4 = vpack.c.bf16 %v909_v47, %v905_v56 }
  0xde   :  { %v688_v60 = vmul.f32 %v2766_v33, %v2718_v19  ;;  %v1929_v0 = vpop.eup %1928  ;;  %vm858_vm15 = vweird.f32 %v1925_v26  ;;  %v2790_v14 = vadd.f32 %v588_v2, %v570_v59  ;;  %vm693_vm0 = vweird.f32 %v2766_v33  ;;  %v552_v19 = vpop.f32.mrf.mxu1 }
  0xdf   :  { %v854_v63 = vsub.f32 1.0, %v853_v57  ;;  %v2788_v5 = vadd.f32 1.0, %v1929_v0  ;;  %vm2796_vm1 = vcmp.eq.f32.partialorder %v696_v61, 8.507059e+37  ;;  %v699_v12 = vor.u32 1.1754944e-38, %v698_v16  ;;  %1194 = vmatmul.bf16.gmra.mxu0 %v917_v4  ;;  %vm859_vm2 = vmor %vm857_vm12, %vm858_vm15  ;;  %v571_v34 = vpop.f32.mrf.mxu2 }
  0xe0   :  { %v689_v58 = vsub.f32 1.0, %v688_v60  ;;  %v2792_v8 = vpop.eup %1930  ;;  %v534_v18 = vadd.f32 %v533_v3, %v2554_v21  ;;  %vm707_vm3 = vweird.f32 %v2757_v40  ;;  %v711_v22 = vand.u32 2147483647, %v2757_v40  ;;  %vm2815_vm4 = vmor %vm692_vm13, %vm693_vm0 }
  0xe1   :  { %v855_v53 = vmul.f32 %v1925_v26, %v854_v63  ;;  %v1933_v13 = vpop.eup %1932  ;;  %v703_v17 = vmul.f32 %v2792_v8, %v2757_v40  ;;  %1936 = vrcp.f32 %v2788_v5  ;;  %v713_v23 = vand.u32 2147483648, %v2757_v40  ;;  %v590_v59 = vpop.f32.mrf.mxu3 }
  0xe2   :  { %v690_v9 = vmul.f32 %v2766_v33, %v689_v58  ;;  %v748_v62 = vmul.f32 %v1933_v13, %v2759_v46  ;;  %v1935_v27 = vpop.eup %1934  ;;  %v756_v30 = vand.u32 2147483647, %v2759_v46  ;;  %v1638_v32 = vmul.f32 -1.442695, %v2790_v14 }
  0xe3   :  { %v856_v36 = vadd.f32 %v1925_v26, %v855_v53  ;;  %v704_v15 = vsub.f32 1.0, %v703_v17  ;;  %v2826_v41 = vadd.f32 1.0, %v1935_v27  ;;  %vm752_vm5 = vweird.f32 %v2759_v46 }
  0xe4   :  { %v691_v20 = vadd.f32 %v2766_v33, %v690_v9  ;;  %v749_v38 = vsub.f32 1.0, %v748_v62  ;;  %v758_v28 = vand.u32 2147483648, %v2759_v46  ;;  %v2831_v43 = vadd.f32 %v552_v19, %v534_v18 }
  0xe5   :  { %v860_v29 = vsel %vm859_vm2, %v1925_v26, %v856_v36  ;;  %v705_v42 = vmul.f32 %v2792_v8, %v704_v15  ;;  %vm753_vm6 = vweird.f32 %v1933_v13  ;;  %1938 = vrcp.f32 %v2826_v41 }
  0xe6   :  { %v865_v7 = vsel %vm2784_vm14, %v864_v25, %v860_v29  ;;  %v695_v37 = vsel %vm2815_vm4, %v2766_v33, %v691_v20  ;;  %v750_v35 = vmul.f32 %v1933_v13, %v749_v38  ;;  %v572_v45 = vadd.f32 %v571_v34, %v2587_v51  ;;  %vm754_vm9 = vmor %vm752_vm5, %vm753_vm6 }
  0xe7   :  { %v1937_v24 = vpop.eup %1936  ;;  %v910_v39 = vmul.f32 %v865_v7, %v2624_v10  ;;  %v700_v26 = vsel %vm2796_vm1, %v699_v12, %v695_v37  ;;  %vm708_vm7 = vweird.f32 %v2792_v8  ;;  %vm2839_vm8 = vcmp.eq.f32.partialorder %v756_v30, 8.507059e+37 }
  0xe8   :  { %v706_v48 = vadd.f32 %v2792_v8, %v705_v42  ;;  %v751_v50 = vadd.f32 %v1933_v13, %v750_v35  ;;  %v763_v33 = vmul.f32 %v1937_v24, %v2788_v5  ;;  %1940 = vpow2.f32 %v1638_v32  ;;  %vm2857_vm10 = vmor %vm707_vm3, %vm708_vm7 }
  0xe9   :  { %v759_v51 = vor.u32 1.1754944e-38, %v758_v28  ;;  %v771_v10 = vand.u32 2147483647, %v2788_v5  ;;  %v773_v56 = vand.u32 2147483648, %v2788_v5  ;;  %v1641_v57 = vmul.f32 -1.442695, %v2831_v43 }
  0xea   :  { %v899_v49 = vmul.f32 %v700_v26, %v2632_v44  ;;  %v755_v60 = vsel %vm754_vm9, %v1933_v13, %v751_v50  ;;  %v764_v61 = vsub.f32 1.0, %v763_v33  ;;  %v2851_v16 = vadd.f32 %v590_v59, %v572_v45 }
  0xeb   :  { %v760_v63 = vsel %vm2839_vm8, %v759_v51, %v755_v60  ;;  %vm768_vm11 = vweird.f32 %v1937_v24  ;;  %1942 = vpow2.f32 %v1641_v57  ;;  %v918_v0 = vpack.c.bf16 %v910_v39, %v2781_v54  ;;  %v2864_v44 = vpop.eup %1938 }
  0xec   :  { %v710_v1 = vsel %vm2857_vm10, %v2792_v8, %v706_v48  ;;  %v903_v25 = vmul.f32 %v760_v63, %v2676_v55  ;;  %v765_v40 = vmul.f32 %v1937_v24, %v764_v61  ;;  %v1642_v58 = vmul.f32 -1.442695, %v2851_v16 }
  0xed   :  { %vm712_vm12 = vcmp.eq.f32.partialorder %v711_v22, 8.507059e+37  ;;  %v714_v2 = vor.u32 1.1754944e-38, %v713_v23  ;;  %vm767_vm13 = vweird.f32 %v2788_v5  ;;  %1213 = vmatmul.bf16.gmra.mxu1 %v918_v0  ;;  %v808_v54 = vmul.f32 %v2864_v44, %v2826_v41 }
  0xee   :  { %v1941_v3 = vpop.eup %1940  ;;  %v915_v4 = vpack.c.bf16 %v903_v25, %v899_v49  ;;  %v766_v53 = vadd.f32 %v1937_v24, %v765_v40  ;;  %1944 = vpow2.f32 %v1642_v58  ;;  %vm769_vm14 = vmor %vm767_vm13, %vm768_vm11  ;;  %v774_v8 = vor.u32 1.1754944e-38, %v773_v56 }
  0xef   :  { %v715_v9 = vsel %vm712_vm12, %v714_v2, %v710_v1  ;;  %v652_v55 = vadd.f32 1.0, %v1941_v3  ;;  %vm772_vm15 = vcmp.eq.f32.partialorder %v771_v10, 8.507059e+37  ;;  %v809_v17 = vsub.f32 1.0, %v808_v54 }
  0xf0   :  { %v770_v11 = vsel %vm769_vm14, %v1937_v24, %v766_v53  ;;  %1227 = vmatmul.bf16.vlgmr.msra.gmra.mxu2 %v915_v4  ;;  %v900_v5 = vmul.f32 %v715_v9, %v2674_v52  ;;  %v818_v21 = vand.u32 2147483648, %v2826_v41  ;;  %vm813_vm0 = vweird.f32 %v2864_v44 }
  0xf1   :  { %v1943_v12 = vpop.eup %1942  ;;  %v775_v13 = vsel %vm772_vm15, %v774_v8, %v770_v11  ;;  %1946 = vrcp.f32 %v652_v55  ;;  %v810_v23 = vmul.f32 %v2864_v44, %v809_v17  ;;  %vm812_vm1 = vweird.f32 %v2826_v41 }
  0xf2   :  { %v904_v36 = vmul.f32 %v775_v13, %v2697_v6  ;;  %v655_v18 = vadd.f32 1.0, %v1943_v12  ;;  %v816_v32 = vand.u32 2147483647, %v2826_v41  ;;  %vm2883_vm2 = vmor %vm812_vm1, %vm813_vm0  ;;  %v819_v37 = vor.u32 1.1754944e-38, %v818_v21 }
  0xf3   :  { %v811_v30 = vadd.f32 %v2864_v44, %v810_v23  ;;  %vm827_vm6 = vweird.f32 %v652_v55  ;;  %v831_v41 = vand.u32 2147483647, %v652_v55  ;;  %v833_v26 = vand.u32 2147483648, %v652_v55 }
  0xf4   :  { %v1945_v20 = vpop.eup %1944  ;;  %v916_v22 = vpack.c.bf16 %v904_v36, %v900_v5  ;;  %1948 = vrcp.f32 %v655_v18  ;;  %v876_v28 = vand.u32 2147483647, %v655_v18  ;;  %v878_v35 = vand.u32 2147483648, %v655_v18 }
  0xf5   :  { %v656_v62 = vadd.f32 1.0, %v1945_v20  ;;  %v815_v42 = vsel %vm2883_vm2, %v2864_v44, %v811_v30  ;;  %vm817_vm5 = vcmp.eq.f32.partialorder %v816_v32, 8.507059e+37  ;;  %vm872_vm8 = vweird.f32 %v655_v18 }
  0xf6   :  { %1246 = vmatmul.bf16.vlgmr.msra.gmra.mxu3 %v916_v22  ;;  %v820_v47 = vsel %vm817_vm5, %v819_v37, %v815_v42  ;;  %vm877_vm10 = vcmp.eq.f32.partialorder %v876_v28, 8.507059e+37  ;;  %v879_v51 = vor.u32 1.1754944e-38, %v878_v35  ;;  %vm832_vm12 = vcmp.eq.f32.partialorder %v831_v41, 8.507059e+37 }
  0xf7   :  { %v1947_v27 = vpop.eup %1946  ;;  %1950 = vrcp.f32 %v656_v62  ;;  %v891_v10 = vand.u32 2147483647, %v656_v62  ;;  %v893_v56 = vand.u32 2147483648, %v656_v62  ;;  %v834_v60 = vor.u32 1.1754944e-38, %v833_v26 }
  0xf8   :  { %v823_v29 = vmul.f32 %v1947_v27, %v652_v55  ;;  %vm828_vm3 = vweird.f32 %v1947_v27  ;;  %v907_v46 = vmul.f32 %v820_v47, %v2739_v31  ;;  %vm887_vm13 = vweird.f32 %v656_v62  ;;  %v1887_v31 = vld [vmem:[%s2945_s4] ss:$0 sm:$0xff] }
  0xf9   :  { %vm2890_vm7 = vmor %vm827_vm6, %vm828_vm3  ;;  %v894_v1 = vor.u32 1.1754944e-38, %v893_v56  ;;  %vm892_vm15 = vcmp.eq.f32.partialorder %v891_v10, 8.507059e+37 }
  0xfa   :  { %v1949_v15 = vpop.eup %1948  ;;  %v824_v52 = vsub.f32 1.0, %v823_v29 }
  0xfb   :  { %v868_v6 = vmul.f32 %v1949_v15, %v655_v18  ;;  %vm873_vm4 = vweird.f32 %v1949_v15 }
  0xfc   :  { %v825_v34 = vmul.f32 %v1947_v27, %v824_v52  ;;  %vm874_vm9 = vmor %vm872_vm8, %vm873_vm4  ;;  %v1257_v52 = vld [vmem:[%s2947_s5] sm:$0x1] }
  0xfd   :  { %v869_v38 = vsub.f32 1.0, %v868_v6  ;;  %v1951_v19 = vpop.eup %1950 }
  0xfe   :  { %v826_v45 = vadd.f32 %v1947_v27, %v825_v34  ;;  %v883_v39 = vmul.f32 %v1951_v19, %v656_v62  ;;  %vm888_vm11 = vweird.f32 %v1951_v19 }
  0xff   :  { %v870_v24 = vmul.f32 %v1949_v15, %v869_v38  ;;  %vm889_vm14 = vmor %vm887_vm13, %vm888_vm11  ;;  %v1258_v38 = vunpack.c.l.bf16 %v1257_v52 }
 0x100   :  { %v884_v33 = vsub.f32 1.0, %v883_v39  ;;  %v830_v57 = vsel %vm2890_vm7, %v1947_v27, %v826_v45 }
 0x101   :  { %v871_v50 = vadd.f32 %v1949_v15, %v870_v24  ;;  %v835_v44 = vsel %vm832_vm12, %v834_v60, %v830_v57  ;;  %vm1259_vm0 = vcmp.ne.f32.partialorder %v1258_v38, 0.0 }
 0x102   :  { %v885_v49 = vmul.f32 %v1951_v19, %v884_v33  ;;  %v908_v2 = vmul.f32 %v835_v44, %v2790_v14 }
 0x103   :  { %v875_v59 = vsel %vm874_vm9, %v1949_v15, %v871_v50 }
 0x104   :  { %v880_v61 = vsel %vm877_vm10, %v879_v51, %v875_v59  ;;  %v886_v0 = vadd.f32 %v1951_v19, %v885_v49  ;;  %v1968_v51 = vmov 0  }
 0x105   :  { %v911_v63 = vmul.f32 %v880_v61, %v2831_v43  ;;  %v1336_v10 = vsel %vm1259_vm0, 1, %v1968_v51 }
 0x106   :  { %v890_v25 = vsel %vm889_vm14, %v1951_v19, %v886_v0 }
 0x107   :  { %v919_v40 = vpack.c.bf16 %v911_v63, %v907_v46  ;;  %v895_v58 = vsel %vm892_vm15, %v894_v1, %v890_v25  ;;  %v1337_v63 = vperm.slane %v1336_v10, 0 }
 0x108   :  { %v912_v3 = vmul.f32 %v895_v58, %v2851_v16 }
 0x109   :  { %1232 = vmatmul.bf16.gmra.mxu2 %v919_v40  ;;  %vm2921_vm7 = vcmp.eq.s32.totalorder %v1337_v63, 1 }
 0x10a   :  { %v920_v4 = vpack.c.bf16 %v912_v3, %v908_v2 }
 0x10c   :  { %1251 = vmatmul.bf16.gmra.mxu3 %v920_v4 }
 0x14a   :  { %v1190_v53 = vpop.f32.mrf.mxu0 }
 0x14b   :  { %v1191_v9 = vadd.f32 %v1887_v31, %v1190_v53 }
 0x152   :  { %v1192_v11 = vpop.f32.mrf.mxu0 }
 0x153   :  { %v1193_v5 = vadd.f32 %v1887_v31, %v1192_v11 }
 0x154   :  { %v1209_v43 = vpop.f32.mrf.mxu1 }
 0x155   :  { %v1210_v8 = vadd.f32 %v1209_v43, %v1191_v9 }
 0x15c   :  { %v1211_v14 = vpop.f32.mrf.mxu1  ;;  %v1195_v29 = vpop.f32.mrf.mxu0 }
 0x15d   :  { %v1212_v17 = vadd.f32 %v1211_v14, %v1193_v5  ;;  %v1196_v15 = vadd.f32 %v1887_v31, %v1195_v29 }
 0x164   :  { %v1197_v42 = vpop.f32.mrf.mxu0 }
 0x165   :  { %v1198_v41 = vadd.f32 %v1887_v31, %v1197_v42 }
 0x16a   :  { %v1214_v21 = vpop.f32.mrf.mxu1 }
 0x16b   :  { %v1215_v34 = vadd.f32 %v1214_v21, %v1196_v15 }
 0x172   :  { %v1216_v24 = vpop.f32.mrf.mxu1 }
 0x173   :  { %v1228_v54 = vpop.f32.mrf.mxu2  ;;  %v1217_v50 = vadd.f32 %v1216_v24, %v1198_v41 }
 0x174   :  { %v1229_v55 = vadd.f32 %v1228_v54, %v1210_v8 }
 0x179   :  { %v1247_v12 = vpop.f32.mrf.mxu3 }
 0x17a   :  { %v2903_v13 = vadd.f32 %v1247_v12, %v1229_v55 }
 0x17b   :  { %v1230_v36 = vpop.f32.mrf.mxu2 }
 0x17c   :  { %v1771_v16 = vmul.f32 -1.442695, %v2903_v13  ;;  %v1231_v18 = vadd.f32 %v1230_v36, %v1212_v17 }
 0x17e   :  { %1952 = vpow2.f32 %v1771_v16 }
 0x181   :  { %v1249_v20 = vpop.f32.mrf.mxu3 }
 0x182   :  { %v2906_v22 = vadd.f32 %v1249_v20, %v1231_v18 }
 0x184   :  { %v1953_v23 = vpop.eup %1952  ;;  %v1772_v62 = vmul.f32 -1.442695, %v2906_v22 }
 0x185   :  { %v1272_v27 = vadd.f32 1.0, %v1953_v23 }
 0x186   :  { %1954 = vpow2.f32 %v1772_v62 }
 0x187   :  { %1956 = vrcp.f32 %v1272_v27  ;;  %v1287_v57 = vand.u32 2147483648, %v1272_v27  ;;  %vm1281_vm2 = vweird.f32 %v1272_v27  ;;  %v1285_v49 = vand.u32 2147483647, %v1272_v27 }
 0x189   :  { %v1288_v2 = vor.u32 1.1754944e-38, %v1287_v57  ;;  %vm1286_vm5 = vcmp.eq.f32.partialorder %v1285_v49, 8.507059e+37 }
 0x18c   :  { %v1955_v30 = vpop.eup %1954  ;;  %v1233_v6 = vpop.f32.mrf.mxu2 }
 0x18d   :  { %v1957_v32 = vpop.eup %1956  ;;  %v1273_v7 = vadd.f32 1.0, %v1955_v30  ;;  %v1234_v19 = vadd.f32 %v1233_v6, %v1215_v34 }
 0x18e   :  { %v1277_v37 = vmul.f32 %v1957_v32, %v1272_v27  ;;  %vm1282_vm1 = vweird.f32 %v1957_v32 }
 0x18f   :  { %1958 = vrcp.f32 %v1273_v7  ;;  %v1252_v35 = vpop.f32.mrf.mxu3  ;;  %vm2915_vm3 = vmor %vm1281_vm2, %vm1282_vm1  ;;  %v1302_v0 = vand.u32 2147483648, %v1273_v7  ;;  %v1300_v40 = vand.u32 2147483647, %v1273_v7  ;;  %vm1296_vm6 = vweird.f32 %v1273_v7 }
 0x190   :  { %v1278_v28 = vsub.f32 1.0, %v1277_v37  ;;  %v2912_v45 = vadd.f32 %v1252_v35, %v1234_v19 }
 0x191   :  { %v1303_v54 = vor.u32 1.1754944e-38, %v1302_v0  ;;  %vm1301_vm9 = vcmp.eq.f32.partialorder %v1300_v40, 8.507059e+37 }
 0x192   :  { %v1279_v39 = vmul.f32 %v1957_v32, %v1278_v28  ;;  %v1773_v26 = vmul.f32 -1.442695, %v2912_v45 }
 0x194   :  { %v1235_v47 = vpop.f32.mrf.mxu2  ;;  %1960 = vpow2.f32 %v1773_v26  ;;  %v1280_v33 = vadd.f32 %v1957_v32, %v1279_v39 }
 0x195   :  { %v1959_v48 = vpop.eup %1958  ;;  %v1236_v59 = vadd.f32 %v1235_v47, %v1217_v50 }
 0x196   :  { %v1292_v56 = vmul.f32 %v1959_v48, %v1273_v7  ;;  %v1284_v1 = vsel %vm2915_vm3, %v1957_v32, %v1280_v33  ;;  %vm1297_vm4 = vweird.f32 %v1959_v48 }
 0x197   :  { %v1254_v61 = vpop.f32.mrf.mxu3  ;;  %v1289_v31 = vsel %vm1286_vm5, %v1288_v2, %v1284_v1  ;;  %vm1298_vm8 = vmor %vm1296_vm6, %vm1297_vm4 }
 0x198   :  { %v1293_v60 = vsub.f32 1.0, %v1292_v56  ;;  %v1255_v44 = vadd.f32 %v1254_v61, %v1236_v59  ;;  %v1339_v55 = vsel %vm2921_vm7, %v1289_v31, %v2903_v13 }
 0x19a   :  { %v1294_v25 = vmul.f32 %v1959_v48, %v1293_v60  ;;  %v1961_v58 = vpop.eup %1960  ;;  %v1774_v3 = vmul.f32 -1.442695, %v1255_v44 }
 0x19b   :  { %v1274_v53 = vadd.f32 1.0, %v1961_v58 }
 0x19c   :  { %v1295_v4 = vadd.f32 %v1959_v48, %v1294_v25  ;;  %1962 = vpow2.f32 %v1774_v3 }
 0x19d   :  { %1964 = vrcp.f32 %v1274_v53  ;;  %v1317_v62 = vand.u32 2147483648, %v1274_v53  ;;  %vm1311_vm11 = vweird.f32 %v1274_v53  ;;  %v1315_v27 = vand.u32 2147483647, %v1274_v53 }
 0x19e   :  { %v1299_v9 = vsel %vm1298_vm8, %v1959_v48, %v1295_v4 }
 0x19f   :  { %v1304_v8 = vsel %vm1301_vm9, %v1303_v54, %v1299_v9  ;;  %v1318_v52 = vor.u32 1.1754944e-38, %v1317_v62  ;;  %vm1316_vm14 = vcmp.eq.f32.partialorder %v1315_v27, 8.507059e+37 }
 0x1a0   :  { %v1340_v11 = vsel %vm2921_vm7, %v1304_v8, %v2906_v22 }
 0x1a1   :  { %v1878_v12 = vpack.c.bf16 %v1340_v11, %v1339_v55 }
 0x1a2   :  { %v1963_v14 = vpop.eup %1962 }
 0x1a3   :  { %1879 = vst [vmem:[%s2948_s6] sm:$0xff] %v1878_v12   ;;  %v1965_v5 = vpop.eup %1964  ;;  %v1275_v16 = vadd.f32 1.0, %v1963_v14 }
 0x1a4   :  { %v1307_v36 = vmul.f32 %v1965_v5, %v1274_v53  ;;  %vm1312_vm10 = vweird.f32 %v1965_v5 }
 0x1a5   :  { %1966 = vrcp.f32 %v1275_v16  ;;  %vm1313_vm12 = vmor %vm1311_vm11, %vm1312_vm10  ;;  %v1332_v29 = vand.u32 2147483648, %v1275_v16  ;;  %v1330_v30 = vand.u32 2147483647, %v1275_v16  ;;  %vm1326_vm15 = vweird.f32 %v1275_v16 }
 0x1a6   :  { %v1308_v17 = vsub.f32 1.0, %v1307_v36 }
 0x1a7   :  { %v1333_v34 = vor.u32 1.1754944e-38, %v1332_v29  ;;  %vm1331_vm1 = vcmp.eq.f32.partialorder %v1330_v30, 8.507059e+37 }
 0x1a8   :  { %v1309_v18 = vmul.f32 %v1965_v5, %v1308_v17 }
 0x1aa   :  { %v1310_v23 = vadd.f32 %v1965_v5, %v1309_v18 }
 0x1ab   :  { %v1967_v20 = vpop.eup %1966 }
 0x1ac   :  { %v1322_v13 = vmul.f32 %v1967_v20, %v1275_v16  ;;  %v1314_v21 = vsel %vm1313_vm12, %v1965_v5, %v1310_v23  ;;  %vm1327_vm13 = vweird.f32 %v1967_v20 }
 0x1ad   :  { %v1319_v32 = vsel %vm1316_vm14, %v1318_v52, %v1314_v21  ;;  %vm1328_vm0 = vmor %vm1326_vm15, %vm1327_vm13 }
 0x1ae   :  { %v1323_v22 = vsub.f32 1.0, %v1322_v13  ;;  %v1341_v38 = vsel %vm2921_vm7, %v1319_v32, %v2912_v45 }
 0x1b0   :  { %v1324_v15 = vmul.f32 %v1967_v20, %v1323_v22 }
 0x1b2   :  { %v1325_v6 = vadd.f32 %v1967_v20, %v1324_v15 }
 0x1b4   :  { %v1329_v7 = vsel %vm1328_vm0, %v1967_v20, %v1325_v6 }
 0x1b5   :  { %v1334_v37 = vsel %vm1331_vm1, %v1333_v34, %v1329_v7 }
 0x1b6   :  { %v1342_v19 = vsel %vm2921_vm7, %v1334_v37, %v1255_v44 }
 0x1b7   :  { %v1883_v42 = vpack.c.bf16 %v1342_v19, %v1341_v38 }
 0x1b9   :  { %1885 = vst [vmem:[%s2948_s6 + $0x8] sm:$0xff] %v1883_v42  }

</bundles_post_ra>
